<compile_context>
chip_gen: v7x
topology: tpu7x:2x2x1
jax: 0.10.0
libtpu: 0.0.40
codegen_flags: <defaults>
</compile_context>

<pallas_src>
import functools

import jax
import jax.numpy as jnp
from jax.experimental import pallas as pl
from jax.experimental.pallas import tpu as pltpu


def _identity_kernel(mix_ref, out_ref):
    # forward() returns the parameter unchanged.
    out_ref[...] = mix_ref[...]


@functools.partial(jax.jit, static_argnames=())
def mixing_forward(mix: jax.Array) -> jax.Array:
    """Pallas equivalent of Mixing.forward(): returns the `mix` parameter.

    mix: (num_head, dim_out, 1)
    """
    num_head, dim_out, one = mix.shape
    total = num_head * dim_out * one

    # Layout: prefer a sublane-dense (rows, 128) slab (fills all 8 sublanes of
    # each vreg) when the element count allows; otherwise a lane-dense (1, N)
    # slab.  Both avoid masked partial stores on the lane axis.
    if total % 128 == 0:
        slab_shape = (total // 128, 128)
    else:
        slab_shape = (1, total)
    flat = mix.reshape(slab_shape)

    out_flat = pl.pallas_call(
        _identity_kernel,
        out_shape=jax.ShapeDtypeStruct(flat.shape, flat.dtype),
        # Gridless whole-array specs: no grid -> no software-pipeline setup.
        # No input_output_aliases: the parameter is persistent/non-donated, so
        # aliasing would only add a defensive copy.
        in_specs=[pl.BlockSpec(memory_space=pltpu.MemorySpace.VMEM)],
        out_specs=pl.BlockSpec(memory_space=pltpu.MemorySpace.VMEM),
    )(flat)

    # TODO(synk): for multi-MiB parameters, switch to a 1-D grid over rows
    # (>=512x128 blocks, "arbitrary"/"parallel" semantics) to stay under the
    # scoped-VMEM limit (v5e 16 MiB / v6e 32 MiB / v7x 32 MiB defaults).
    return out_flat.reshape(num_head, dim_out, one)


class Mixing:
    """JAX/Pallas port of the PyTorch Mixing module."""

    def __init__(self, dim_out: int, num_head: int, key: jax.Array):
        # Stands in for torch.randn(num_head, dim_out, 1).
        self.mix = jax.random.normal(key, (num_head, dim_out, 1), dtype=jnp.float32)

    def __call__(self) -> jax.Array:
        # Optimal would be `return self.mix` (no kernel); the jitted Pallas
        # identity is kept to provide the required kernel boundary.
        return mixing_forward(self.mix)


if __name__ == "__main__":
    key = jax.random.PRNGKey(0)
    dim_out = 32
    num_head = 4

    module = Mixing(dim_out=dim_out, num_head=num_head, key=key)

    out = module()
    out = jax.block_until_ready(out)

    # Sanity check: forward() must return the parameter exactly.
    assert out.shape == (num_head, dim_out, 1), out.shape
    assert out.dtype == jnp.float32
    assert bool(jnp.all(out == module.mix))

    print("KERNEL_OK")
</pallas_src>

<mosaic_0001>
module attributes {stable_mosaic.version = 11 : i64} {
  func.func @_identity_kernel(%arg0: memref<1x128xf32, #tpu.memory_space<vmem>>, %arg1: memref<1x128xf32, #tpu.memory_space<vmem>>) attributes {dimension_semantics = [], scalar_prefetch = 0 : i64, scratch_operands = 0 : i64, tpu.core_type = #tpu.core_type<tc>} {
    %c0 = arith.constant 0 : index
    %c0_0 = arith.constant 0 : index
    %0 = vector.load %arg0[%c0, %c0_0] : memref<1x128xf32, #tpu.memory_space<vmem>>, vector<1x128xf32>
    %c0_1 = arith.constant 0 : index
    %c0_2 = arith.constant 0 : index
    %1 = vector.load %arg1[%c0_1, %c0_2] : memref<1x128xf32, #tpu.memory_space<vmem>>, vector<1x128xf32>
    tpu.vector_store %arg1[%c0_1, %c0_2], %0 {strides = array<i32>} : memref<1x128xf32, #tpu.memory_space<vmem>>, vector<1x128xf32>,
    return
  }
}

</mosaic_0001>

<bundles_post_ra>
// kernel: mixing_forward.1
= control target key start
LH: loop header
LB: loop body
LE: loop exit
PB: predicated region body
PF: predicated region fallthrough
CT: control target
= control target key end

     0   :  { %s30_s0 = inlined_call_operand.vmem [shape: f32[1,128], index: 0, kind: input, shape index: {}]   ;;  %s31_s1 = inlined_call_operand.vmem [shape: f32[1,128], index: 1, kind: output, shape index: {}]  }
   0x1   :  { %v8_v0 = vld [vmem:[%s30_s0] sm:$0x1] }
   0x2   :  { %9 = vst [vmem:[%s31_s1] sm:$0x1] %v8_v0 }

</bundles_post_ra>
